<compile_context>
chip_gen: v7x
topology: tpu7x:2x2x1
jax: 0.10.0
libtpu: 0.0.40
codegen_flags: <defaults>
</compile_context>

<pallas_src>
import functools

import jax
import jax.numpy as jnp
from jax import lax
from jax.experimental import pallas as pl
from jax.experimental.pallas import tpu as pltpu

LANES = 128
ACC_SUBLANES = 8                      # f32 accumulator tile (8, 128)
TARGET_BLOCK_BYTES = 4 * 1024 * 1024  # per-input block; 2 inputs x 2 buffers = 16 MiB
VMEM_LIMIT_BYTES = 32 * 1024 * 1024   # explicit scoped-VMEM limit (safe on v5e/v6e/v7x)


def _round_up(a, m):
    return (a + m - 1) // m * m


def _cdiv(a, b):
    return (a + b - 1) // b


def _sublane_pack(dtype):
    # Packed-sublane multiple for the dtype: 8 (f32), 16 (bf16/f16), 32 (int8/fp8).
    itemsize = jnp.dtype(dtype).itemsize
    return 8 * max(1, 4 // max(1, itemsize))


def _mse_kernel(x_ref, y_ref, o_ref, acc_ref, *, inv_total, tile_rows, rows_last):
    j = pl.program_id(0)
    nsteps = pl.num_programs(0)

    @pl.when(j == 0)
    def _():
        acc_ref[...] = jnp.zeros_like(acc_ref)

    def accumulate(valid_rows):
        # Cast to f32 on-vreg (inputs stream in native dtype).
        d = x_ref[...].astype(jnp.float32) - y_ref[...].astype(jnp.float32)
        sq = d * d
        if valid_rows is not None:
            # Grid-tail block: rows >= valid_rows are out-of-bounds (undefined on
            # read) -> mask the squared diff before accumulating.
            row = lax.broadcasted_iota(jnp.int32, (tile_rows, LANES), 0)
            sq = jnp.where(row < valid_rows, sq, 0.0)
        # Keep the accumulation vector-shaped (8, 128): pure VPU adds every step,
        # the cross-lane/sublane XLU reduce happens exactly once in the epilogue.
        acc_ref[...] += jnp.sum(sq.reshape(-1, ACC_SUBLANES, LANES), axis=0)

    if rows_last == tile_rows:
        # Every block is fully in-bounds: no masking anywhere (clean steady state).
        accumulate(None)
    else:
        @pl.when(j < nsteps - 1)
        def _():
            accumulate(None)

        @pl.when(j == nsteps - 1)
        def _():
            accumulate(rows_last)

    @pl.when(j == nsteps - 1)
    def _():
        # Fold the 1/total scale into the epilogue (no separate XLA op).
        o_ref[0, 0] = jnp.sum(acc_ref[...]) * inv_total


def _mse_pallas(x, y):
    assert x.size == y.size, "BaseLoss MSE expects x and y with the same element count"
    total = int(x.size)

    x_flat = x.reshape(-1)
    y_flat = y.reshape(-1)

    rem = total % LANES
    if rem:
        # TODO(synk): lane-unaligned totals (total % 128 != 0) cannot be viewed as a
        # (rows, 128) array without a copy; pad both inputs with the same value (0)
        # to the next lane multiple so the padded diff contributes exactly 0.  All
        # lane-aligned sizes (the hot path for real loss tensors) take the
        # zero-copy branch and the grid tail is masked inside the kernel instead.
        pad = LANES - rem
        x_flat = jnp.pad(x_flat, (0, pad))
        y_flat = jnp.pad(y_flat, (0, pad))

    rows = x_flat.size // LANES
    x2d = x_flat.reshape(rows, LANES)
    y2d = y_flat.reshape(rows, LANES)

    # Byte-sized, dtype-aware block: ~4 MiB per input, rounded to the packed-sublane
    # multiple of the narrowest dtype involved.
    pack = max(_sublane_pack(x.dtype), _sublane_pack(y.dtype))
    max_itemsize = max(jnp.dtype(x.dtype).itemsize, jnp.dtype(y.dtype).itemsize)
    target_rows = TARGET_BLOCK_BYTES // (LANES * max_itemsize)
    tile_rows = min(target_rows, _round_up(rows, pack))
    tile_rows = max(tile_rows, pack)

    steps = _cdiv(rows, tile_rows)
    rows_last = rows - (steps - 1) * tile_rows   # valid rows in the final block

    inv_total = 1.0 / float(total)
    true_bytes = (x.size * jnp.dtype(x.dtype).itemsize
                  + y.size * jnp.dtype(y.dtype).itemsize)

    # Note: inv_total / tile_rows / rows_last are baked in, so each distinct input
    # shape compiles its own kernel (fine for static-shape training loops).
    kernel = functools.partial(
        _mse_kernel, inv_total=inv_total, tile_rows=tile_rows, rows_last=rows_last
    )

    out = pl.pallas_call(
        kernel,
        out_shape=jax.ShapeDtypeStruct((1, 1), jnp.float32),
        grid_spec=pltpu.PrefetchScalarGridSpec(
            num_scalar_prefetch=0,
            grid=(steps,),
            in_specs=[
                pl.BlockSpec((tile_rows, LANES), lambda j: (j, 0)),
                pl.BlockSpec((tile_rows, LANES), lambda j: (j, 0)),
            ],
            out_specs=pl.BlockSpec((1, 1), lambda j: (0, 0), memory_space=pltpu.SMEM),
            scratch_shapes=[pltpu.VMEM((ACC_SUBLANES, LANES), jnp.float32)],
        ),
        compiler_params=pltpu.CompilerParams(
            dimension_semantics=("arbitrary",),
            vmem_limit_bytes=VMEM_LIMIT_BYTES,
        ),
        cost_estimate=pl.CostEstimate(
            flops=3 * total,
            transcendentals=0,
            bytes_accessed=true_bytes + 4,
        ),
    )(x2d, y2d)

    return out[0, 0]


def gifdict(d, key):
    # Mirror of the helper used by BaseLoss.forward (dict lookup with
    # '.'-separated nesting).
    for k in key.split("."):
        d = d[k]
    return d


class BaseLoss:
    """JAX/Pallas port of BaseLoss.

    forward() reproduces the item_map dispatch exactly; run() — abstract in the
    PyTorch base class — is given the canonical MSE hot path, computed fully
    inside a Pallas TPU kernel.
    """

    def __init__(self, item_map=None):
        # TODO(synk): BaseLoss.run is abstract (NotImplementedError) in the
        # reference; MSE is used as the concrete kernel so forward() is exercisable.
        self.item_map = item_map if item_map is not None else dict(x="x", y="y")

    def run(self, x, y):
        return _mse_pallas(x, y)

    def forward(self, ddata):
        if isinstance(self.item_map, list):
            res = {}
            for idx, _item_map in enumerate(self.item_map):
                result_i = self.run(
                    **{k: gifdict(ddata, v) for k, v in _item_map.items()}
                )
                if not isinstance(result_i, dict):
                    result_i = {str(idx): result_i}
                else:
                    result_i = {str(idx) + "-" + k: v for k, v in result_i.items()}
                res.update(result_i)
            return res
        else:
            return self.run(
                **{k: gifdict(ddata, v) for k, v in self.item_map.items()}
            )

    __call__ = forward


if __name__ == "__main__":
    key = jax.random.PRNGKey(0)
    kx, ky, ka, kb, kc, kd, ke, kf = jax.random.split(key, 8)

    loss_mod = BaseLoss(item_map=dict(x="x", y="y"))

    # 1) Main case: NCHW f32, lane-aligned -> zero-copy path, single unmasked block.
    x = jax.random.normal(kx, (2, 4, 16, 16), dtype=jnp.float32)
    y = jax.random.normal(ky, (2, 4, 16, 16), dtype=jnp.float32)
    out = jax.block_until_ready(loss_mod({"x": x, "y": y}))
    ref = jnp.mean((x - y) ** 2)
    assert jnp.allclose(out, ref, rtol=1e-5, atol=1e-5), (out, ref)

    # 2) Awkward non-lane-aligned shape -> pad-to-128 fallback + in-kernel row mask.
    a = jax.random.normal(ka, (3, 5, 7, 11), dtype=jnp.float32)
    b = jax.random.normal(kb, (3, 5, 7, 11), dtype=jnp.float32)
    out2 = jax.block_until_ready(loss_mod({"x": a, "y": b}))
    ref2 = jnp.mean((a - b) ** 2)
    assert jnp.allclose(out2, ref2, rtol=1e-5, atol=1e-5), (out2, ref2)

    # 3) Larger lane-aligned f32: multiple grid steps + masked grid-tail block,
    #    zero pad copies (rows = 8248, tile_rows = 8192, steps = 2, last = 56 rows).
    c = jax.random.normal(kc, (8, 1031, 128), dtype=jnp.float32)
    d = jax.random.normal(kd, (8, 1031, 128), dtype=jnp.float32)
    out3 = jax.block_until_ready(loss_mod({"x": c, "y": d}))
    ref3 = jnp.mean((c - d) ** 2)
    assert jnp.allclose(out3, ref3, rtol=1e-4, atol=1e-6), (out3, ref3)

    # 4) bf16 inputs: exercises the packed-sublane (16, 128) tile rounding; the cast
    #    to f32 happens on-vreg inside the kernel.
    e = jax.random.normal(ke, (4, 16, 32), dtype=jnp.bfloat16)
    f = jax.random.normal(kf, (4, 16, 32), dtype=jnp.bfloat16)
    out4 = jax.block_until_ready(loss_mod({"x": e, "y": f}))
    ref4 = jnp.mean((e.astype(jnp.float32) - f.astype(jnp.float32)) ** 2)
    assert jnp.allclose(out4, ref4, rtol=1e-5, atol=1e-6), (out4, ref4)

    print("KERNEL_OK")
</pallas_src>

<mosaic_0001>
module attributes {stable_mosaic.version = 11 : i64} {
  func.func @_mse_kernel(%arg0: i32, %arg1: memref<16x128xf32, #tpu.memory_space<vmem>>, %arg2: memref<16x128xf32, #tpu.memory_space<vmem>>, %arg3: memref<1x1xf32, #tpu.memory_space<smem>>, %arg4: memref<8x128xf32, #tpu.memory_space<vmem>>) attributes {dimension_semantics = [#tpu.dimension_semantics<arbitrary>], iteration_bounds = array<i64: 1>, scalar_prefetch = 0 : i64, scratch_operands = 1 : i64, tpu.core_type = #tpu.core_type<tc>, window_params = [{transform_indices = @transform_0, window_bounds = array<i64: 16, 128>}, {transform_indices = @transform_1, window_bounds = array<i64: 16, 128>}, {transform_indices = @transform_2, window_bounds = array<i64: 1, 1>}]} {
    %c0_i32 = arith.constant 0 : i32
    %0 = arith.cmpi eq, %arg0, %c0_i32 : i32
    %1 = arith.extui %0 : i1 to i32
    %c0_i32_0 = arith.constant 0 : i32
    %2 = arith.cmpi ne, %1, %c0_i32_0 : i32
    scf.if %2 {
      %cst_10 = arith.constant 0.000000e+00 : f32
      %15 = vector.broadcast %cst_10 : f32 to vector<8x128xf32>
      %c0_11 = arith.constant 0 : index
      %c0_12 = arith.constant 0 : index
      %16 = vector.load %arg4[%c0_11, %c0_12] : memref<8x128xf32, #tpu.memory_space<vmem>>, vector<8x128xf32>
      tpu.vector_store %arg4[%c0_11, %c0_12], %15 {strides = array<i32>} : memref<8x128xf32, #tpu.memory_space<vmem>>, vector<8x128xf32>,
    } else {
    }
    %c0 = arith.constant 0 : index
    %c0_1 = arith.constant 0 : index
    %3 = vector.load %arg1[%c0, %c0_1] : memref<16x128xf32, #tpu.memory_space<vmem>>, vector<16x128xf32>
    %c0_2 = arith.constant 0 : index
    %c0_3 = arith.constant 0 : index
    %4 = vector.load %arg2[%c0_2, %c0_3] : memref<16x128xf32, #tpu.memory_space<vmem>>, vector<16x128xf32>
    %5 = arith.subf %3, %4 : vector<16x128xf32>
    %6 = arith.mulf %5, %5 : vector<16x128xf32>
    %c0_4 = arith.constant 0 : index
    %c0_5 = arith.constant 0 : index
    %7 = vector.load %arg4[%c0_4, %c0_5] : memref<8x128xf32, #tpu.memory_space<vmem>>, vector<8x128xf32>
    %8 = vector.shape_cast %6 : vector<16x128xf32> to vector<2x8x128xf32>
    %cst = arith.constant dense<0.000000e+00> : vector<8x128xf32>
    %9 = vector.multi_reduction <add>, %8, %cst [0] : vector<2x8x128xf32> to vector<8x128xf32>
    %10 = arith.addf %7, %9 : vector<8x128xf32>
    %c0_6 = arith.constant 0 : index
    %c0_7 = arith.constant 0 : index
    %11 = vector.load %arg4[%c0_6, %c0_7] : memref<8x128xf32, #tpu.memory_space<vmem>>, vector<8x128xf32>
    tpu.vector_store %arg4[%c0_6, %c0_7], %10 {strides = array<i32>} : memref<8x128xf32, #tpu.memory_space<vmem>>, vector<8x128xf32>,
    %c0_i32_8 = arith.constant 0 : i32
    %12 = arith.cmpi eq, %arg0, %c0_i32_8 : i32
    %13 = arith.extui %12 : i1 to i32
    %c0_i32_9 = arith.constant 0 : i32
    %14 = arith.cmpi ne, %13, %c0_i32_9 : i32
    scf.if %14 {
      %c0_10 = arith.constant 0 : index
      %c0_11 = arith.constant 0 : index
      %15 = vector.load %arg4[%c0_10, %c0_11] : memref<8x128xf32, #tpu.memory_space<vmem>>, vector<8x128xf32>
      %16 = vector.shape_cast %15 : vector<8x128xf32> to vector<1x8x128xf32>
      %cst_12 = arith.constant dense<0.000000e+00> : vector<1xf32>
      %17 = vector.multi_reduction <add>, %16, %cst_12 [1, 2] : vector<1x8x128xf32> to vector<1xf32>
      %18 = vector.shape_cast %17 : vector<1xf32> to vector<1x1x1xf32>
      %19 = vector.extract %18[0, 0, 0] : f32 from vector<1x1x1xf32>
      %cst_13 = arith.constant 4.8828125E-4 : f32
      %20 = arith.mulf %19, %cst_13 : f32
      %c0_14 = arith.constant 0 : index
      %c0_15 = arith.constant 0 : index
      %21 = memref.load %arg3[%c0_14, %c0_15] : memref<1x1xf32, #tpu.memory_space<smem>>
      memref.store %20, %arg3[%c0_14, %c0_15] : memref<1x1xf32, #tpu.memory_space<smem>>
    } else {
    }
    return
  }
  func.func @transform_0(%arg0: i32) -> (i32, i32) {
    %c0_i32 = arith.constant 0 : i32
    %c0_i32_0 = arith.constant 0 : i32
    return %arg0, %c0_i32 : i32, i32
  }
  func.func @transform_1(%arg0: i32) -> (i32, i32) {
    %c0_i32 = arith.constant 0 : i32
    %c0_i32_0 = arith.constant 0 : i32
    return %arg0, %c0_i32 : i32, i32
  }
  func.func @transform_2(%arg0: i32) -> (i32, i32) {
    %c0_i32 = arith.constant 0 : i32
    %c0_i32_0 = arith.constant 0 : i32
    %c0_i32_1 = arith.constant 0 : i32
    return %c0_i32, %c0_i32_0 : i32, i32
  }
}

</mosaic_0001>

<bundles_post_ra>
// kernel: tpu_custom_call.1
= control target key start
LH: loop header
LB: loop body
LE: loop exit
PB: predicated region body
PF: predicated region fallthrough
CT: control target
= control target key end

     0   :  { %7 = vsyncpa [#allocation4], 0  ;;  %s211_s0 = inlined_call_operand.hbm [shape: f32[16,128], index: 0, kind: input, shape index: {}]   ;;  %s212_s1 = inlined_call_operand.hbm [shape: f32[16,128], index: 1, kind: input, shape index: {}]   ;;  %s213_s2 = inlined_call_operand.hbm [shape: f32[1,1], index: 2, kind: output, shape index: {}]  }
   0x1   :  { %8 = vsyncpa [#allocation7], 0 }
   0x2   :  { %9 = vsyncpa [#allocation5], 0  ;;  %s155_s9 = smov [#allocation3]   ;;  %s95_s13 = scalar_lea.hbm %s211_s0, 256 }
   0x3   :  { %s15_s10 = sshll.u32 %s155_s9, 4  ;;  %p96_p0 = scmp.ne.s32.totalorder %s211_s0, %s95_s13  ;;  %s16_s10 = int_to_ptr.vmem [resolvable:$true] %s15_s10 }
   0x4   :  { %p99_p1 = scmp.lt.u32.totalorder %s95_s13, %s211_s0 }
   0x6   :  { %p101_p2 = pnand %p99_p1, %p96_p0 }
   0x8   :  { %104 = shalt.err (!%p101_p2)
}
   0x9   :  { %s105_s18 = scalar_lea.vmem %s16_s10, 256  ;;  %p110_p4 = scmp.lt.s32.totalorder %s16_s10, %s16_s10 }
   0xa   :  { %p106_p3 = scmp.ne.s32.totalorder %s16_s10, %s105_s18  ;;  %p111_p5 = scmp.lt.s32.totalorder %s105_s18, %s105_s18 }
   0xc   :  { %p112_p6 = por %p111_p5, %p110_p4 }
   0xe   :  { %p113_p7 = pnand %p112_p6, %p106_p3 }
  0x10   :  { %116 = shalt.err (!%p113_p7)
}
  0x11   :  { %s156_s19 = smov 128   ;;  %s157_s20 = smov 8  }
  0x12   :  { %21 = dma.hbm_to_vmem [thread:$0]  %s211_s0, 256, %s16_s10, [#allocation4], %s156_s19, %s156_s19, %s157_s20  }
  0x13   :  { %s158_s23 = smov [#allocation6]   ;;  %s117_s27 = scalar_lea.hbm %s212_s1, 256 }
  0x14   :  { %s27_s24 = sshll.u32 %s158_s23, 4  ;;  %p118_p8 = scmp.ne.s32.totalorder %s212_s1, %s117_s27  ;;  %s28_s24 = int_to_ptr.vmem [resolvable:$true] %s27_s24 }
  0x15   :  { %p121_p9 = scmp.lt.u32.totalorder %s117_s27, %s212_s1 }
  0x17   :  { %p123_p10 = pnand %p121_p9, %p118_p8 }
  0x19   :  { %126 = shalt.err (!%p123_p10)
}
  0x1a   :  { %s127_s4 = scalar_lea.vmem %s28_s24, 256  ;;  %p132_p12 = scmp.lt.s32.totalorder %s28_s24, %s28_s24 }
  0x1b   :  { %p128_p11 = scmp.ne.s32.totalorder %s28_s24, %s127_s4  ;;  %p133_p13 = scmp.lt.s32.totalorder %s127_s4, %s127_s4 }
  0x1d   :  { %p134_p0 = por %p133_p13, %p132_p12 }
  0x1f   :  { %p135_p1 = pnand %p134_p0, %p128_p11 }
  0x21   :  { %138 = shalt.err (!%p135_p1)
}
  0x22   :  { %33 = dma.hbm_to_vmem [thread:$0]  %s212_s1, 256, %s28_s24, [#allocation7], %s156_s19, %s156_s19, %s157_s20  }
  0x23   :  { %149 = dma.done.wait [#allocation4], 256  }
  0x24   :  { %150 = vsyncadd [#allocation4], 4294967040 }
  0x25   :  { %151 = dma.done.wait [#allocation7], 256  }
  0x26   :  { %152 = vsyncadd [#allocation7], 4294967040  ;;  %v45_v0 = vld [vmem:[#allocation3] sm:$0xff]  ;;  %v46_v1 = vld [vmem:[#allocation3 + $0x8] sm:$0xff]  ;;  %s139_s9 = scalar_lea.hbm %s213_s2, 16 }
  0x27   :  { %v47_v2 = vld [vmem:[#allocation6] sm:$0xff]  ;;  %v48_v3 = vld [vmem:[#allocation6 + $0x8] sm:$0xff]  ;;  %p140_p2 = scmp.ne.s32.totalorder %s213_s2, %s139_s9  ;;  %p143_p3 = scmp.lt.u32.totalorder %s139_s9, %s213_s2 }
  0x28   :  { %v49_v4 = vsub.f32 %v45_v0, %v47_v2  ;;  %v50_v5 = vsub.f32 %v46_v1, %v48_v3 }
  0x29   :  { %p145_p4 = pnand %p143_p3, %p140_p2 }
  0x2a   :  { %v51_v6 = vmul.f32 %v49_v4, %v49_v4  ;;  %v52_v7 = vmul.f32 %v50_v5, %v50_v5 }
  0x2c   :  { %v54_v8 = vadd.f32 %v52_v7, %v51_v6 }
  0x2e   :  { %61 = vadd.xlane.f32.xlu0 %v54_v8 }
  0xbb   :  { %v62_v9 = vpop.xlane.xlu0 %61 }
  0xbc   :  { %v63_v10 = vrot.slane %v62_v9, 4 }
  0xbe   :  { %v64_v11 = vadd.f32 %v63_v10, %v62_v9 }
  0xc0   :  { %v65_v12 = vrot.slane %v64_v11, 2 }
  0xc2   :  { %v66_v13 = vadd.f32 %v65_v12, %v64_v11 }
  0xc4   :  { %v67_v14 = vrot.slane %v66_v13, 1 }
  0xc6   :  { %v68_v15 = vadd.f32 %v67_v14, %v66_v13 }
  0xc8   :  { %88 = vpush %v68_v15 }
  0xf9   :  { %s89_s1 = spop %88 }
  0xfa   :  { %s70_s6 = smul.f32 0.00048828125, %s89_s1 }
  0xfc   :  { %72 = sst [smem:[#allocation8]] %s70_s6 }
  0xfd   :  { %148 = shalt.err (!%p145_p4)
}
  0xfe   :  { %s159_s14 = smov [#allocation8]  }
  0xff   :  { %80 = dma.smem_to_hbm %s159_s14, 16, %s213_s2, [#allocation5]  }
 0x100   :  { %153 = dma.done.wait [#allocation5], 16  }
 0x101   :  { %154 = vsyncadd [#allocation5], 4294967280 }
 0x102   :  { %84 = sfence }
 0x103   :  { %85 = vsyncpa [#allocation4], 1 }
 0x104   :  { %86 = vsyncpa [#allocation7], 1 }
 0x105   :  { %87 = vsyncpa [#allocation5], 1 }

</bundles_post_ra>
